<compile_context>
chip_gen: v7x
topology: tpu7x:2x2x1
jax: 0.10.0
libtpu: 0.0.40
codegen_flags: <defaults>
</compile_context>

<pallas_src>
import functools

import jax
import jax.numpy as jnp
from jax import lax
from jax.experimental import pallas as pl
from jax.experimental.pallas import tpu as pltpu

INPUT_DIM = 27
NUM_CLASSES = 2
NL = 1
# Module uses HD=300 / BS=1; small shapes chosen per instructions.
HD = 32
BS = 2
SEQ = 8


def lstm_cls_kernel(x_ref, wih_ref, whh_ref, b_ref, wfc_ref, bfc_ref,
                    out_ref, hn_ref, cn_ref, gx_ref):
    """Whole sequence in one kernel invocation.

    x_ref:   (T*B, D)  time-major, batch folded into rows
    gx_ref:  (T*B, 4H) VMEM scratch holding the precomputed input projection
    hn_ref / cn_ref: (B, H) (NL=1 leading dim squeezed by the BlockSpec)
    """
    B, H = hn_ref.shape
    TB, _ = x_ref.shape
    T = TB // B

    # ---- Hoisted input projection: ONE MXU call, off the serial path -------
    # gx[t*B:(t+1)*B, :] == x_t @ W_ih^T + (b_ih + b_hh) for every time step.
    gx_ref[...] = (jnp.dot(x_ref[...], wih_ref[...],
                           preferred_element_type=jnp.float32)
                   + b_ref[...])

    whh = whh_ref[...]                       # hoisted load, reused every step

    def step(t, carry):
        h, c = carry
        row = pl.multiple_of(t * B, B)
        # Per-step critical path: one (B,H)@(H,4H) matmul + elementwise gates.
        gates = gx_ref[pl.ds(row, B), :] + jnp.dot(
            h, whh, preferred_element_type=jnp.float32)     # (B,4H) order i,f,g,o
        # NOTE: with H=32 the gate slices are 32-lane sub-slices of one vreg;
        # negligible here.
        # TODO(synk): for the real HD=300 model pad H to a multiple of 128 so
        # each gate lands on its own lane-aligned slab.
        i_g = jax.nn.sigmoid(gates[:, 0 * H:1 * H])
        f_g = jax.nn.sigmoid(gates[:, 1 * H:2 * H])
        g_g = jnp.tanh(gates[:, 2 * H:3 * H])
        o_g = jax.nn.sigmoid(gates[:, 3 * H:4 * H])
        c_new = f_g * c + i_g * g_g
        h_new = o_g * jnp.tanh(c_new)
        return h_new, c_new

    h0 = jnp.zeros((B, H), jnp.float32)
    c0 = jnp.zeros((B, H), jnp.float32)
    h_T, c_T = lax.fori_loop(0, T, step, (h0, c0), unroll=True)

    # Final classifier head on the last hidden state (dropout is a no-op).
    logits = jnp.dot(h_T, wfc_ref[...],
                     preferred_element_type=jnp.float32) + bfc_ref[...]
    out_ref[...] = jax.nn.sigmoid(logits)                   # (B, NUM_CLASSES)
    hn_ref[...] = h_T
    cn_ref[...] = c_T


def classifier_lstm_forward(inputs, X_lengths, hidden, params):
    """inputs: (B, T, D) float32, batch_first as in the PyTorch module.
    X_lengths and hidden are accepted but unused (matching the original forward)."""
    del X_lengths, hidden
    B, T, D = inputs.shape
    H = params["w_hh_t"].shape[0]
    C = params["w_fc_t"].shape[1]

    # time-major, batch folded into rows -> one MXU call for the x projection.
    x_tm = jnp.transpose(inputs, (1, 0, 2)).reshape(T * B, D)

    full2 = lambda i: (0, 0)
    grid_spec = pltpu.PrefetchScalarGridSpec(
        num_scalar_prefetch=0,
        grid=(1,),                                            # single grid step
        in_specs=[
            pl.BlockSpec((T * B, D), full2),                  # x (time-major, flat)
            pl.BlockSpec((D, 4 * H), full2),                  # W_ih^T
            pl.BlockSpec((H, 4 * H), full2),                  # W_hh^T
            pl.BlockSpec((1, 4 * H), full2),                  # b_ih + b_hh
            pl.BlockSpec((H, C), full2),                      # W_fc^T
            pl.BlockSpec((1, C), full2),                      # b_fc
        ],
        out_specs=[
            pl.BlockSpec((B, C), full2),                      # sigmoid(fc(h_T))
            pl.BlockSpec((None, B, H), lambda i: (0, 0, 0)),  # h_n (NL squeezed)
            pl.BlockSpec((None, B, H), lambda i: (0, 0, 0)),  # c_n (NL squeezed)
        ],
        scratch_shapes=[
            pltpu.VMEM((T * B, 4 * H), jnp.float32),          # precomputed x-gates
        ],
    )

    out, h_n, c_n = pl.pallas_call(
        lstm_cls_kernel,
        out_shape=(
            jax.ShapeDtypeStruct((B, C), jnp.float32),
            jax.ShapeDtypeStruct((NL, B, H), jnp.float32),
            jax.ShapeDtypeStruct((NL, B, H), jnp.float32),
        ),
        grid_spec=grid_spec,
        compiler_params=pltpu.CompilerParams(
            dimension_semantics=("arbitrary",)),
    )(x_tm, params["w_ih_t"], params["w_hh_t"], params["b"],
      params["w_fc_t"], params["b_fc"])
    return out, (h_n, c_n)


def init_params(key, input_dim, hidden, num_classes):
    """Deterministic init mimicking PyTorch's U(-1/sqrt(H), 1/sqrt(H))."""
    ks = jax.random.split(key, 6)
    k = 1.0 / jnp.sqrt(hidden)
    u = lambda kk, shape: jax.random.uniform(kk, shape, jnp.float32, -k, k)
    w_ih = u(ks[0], (4 * hidden, input_dim))
    w_hh = u(ks[1], (4 * hidden, hidden))
    b_ih = u(ks[2], (4 * hidden,))
    b_hh = u(ks[3], (4 * hidden,))
    w_fc = u(ks[4], (num_classes, hidden))
    b_fc = u(ks[5], (num_classes,))
    return {
        "w_ih_t": w_ih.T,                                   # (D, 4H)
        "w_hh_t": w_hh.T,                                   # (H, 4H)
        "b": (b_ih + b_hh).reshape(1, 4 * hidden),          # (1, 4H)
        "w_fc_t": w_fc.T,                                   # (H, C)
        "b_fc": b_fc.reshape(1, num_classes),               # (1, C)
    }


def reference_forward(inputs, params):
    """Pure-JAX reference (lax.scan LSTM) for a correctness check."""
    B, T, D = inputs.shape
    H = params["w_hh_t"].shape[0]

    def step(carry, x_t):
        h, c = carry
        gates = x_t @ params["w_ih_t"] + h @ params["w_hh_t"] + params["b"]
        i = jax.nn.sigmoid(gates[:, 0 * H:1 * H])
        f = jax.nn.sigmoid(gates[:, 1 * H:2 * H])
        g = jnp.tanh(gates[:, 2 * H:3 * H])
        o = jax.nn.sigmoid(gates[:, 3 * H:4 * H])
        c = f * c + i * g
        h = o * jnp.tanh(c)
        return (h, c), None

    h0 = jnp.zeros((B, H), jnp.float32)
    c0 = jnp.zeros((B, H), jnp.float32)
    (h, c), _ = lax.scan(step, (h0, c0), jnp.transpose(inputs, (1, 0, 2)))
    out = jax.nn.sigmoid(h @ params["w_fc_t"] + params["b_fc"])
    return out, (h[None], c[None])


if __name__ == "__main__":
    key = jax.random.PRNGKey(0)
    k_x, k_p = jax.random.split(key)
    x = jax.random.normal(k_x, (BS, SEQ, INPUT_DIM), jnp.float32)
    x_lengths = jnp.full((BS,), SEQ, jnp.int32)          # unused by the forward
    params = init_params(k_p, INPUT_DIM, HD, NUM_CLASSES)
    hidden0 = (jnp.zeros((NL, BS, HD), jnp.float32),
               jnp.zeros((NL, BS, HD), jnp.float32))     # unused by the forward

    fwd = jax.jit(functools.partial(classifier_lstm_forward, params=params))
    out, (h_n, c_n) = fwd(x, x_lengths, hidden0)
    jax.block_until_ready((out, h_n, c_n))

    ref_out, (ref_h, ref_c) = reference_forward(x, params)
    assert out.shape == (BS, NUM_CLASSES) and h_n.shape == (NL, BS, HD)
    assert jnp.allclose(out, ref_out, atol=1e-5, rtol=1e-5)
    assert jnp.allclose(h_n, ref_h, atol=1e-5, rtol=1e-5)
    assert jnp.allclose(c_n, ref_c, atol=1e-5, rtol=1e-5)
    print("KERNEL_OK")
</pallas_src>

<mosaic_0001>
module attributes {stable_mosaic.version = 11 : i64} {
  func.func @lstm_cls_kernel(%arg0: i32, %arg1: memref<16x27xf32, #tpu.memory_space<vmem>>, %arg2: memref<27x128xf32, #tpu.memory_space<vmem>>, %arg3: memref<32x128xf32, #tpu.memory_space<vmem>>, %arg4: memref<1x128xf32, #tpu.memory_space<vmem>>, %arg5: memref<32x2xf32, #tpu.memory_space<vmem>>, %arg6: memref<1x2xf32, #tpu.memory_space<vmem>>, %arg7: memref<2x2xf32, #tpu.memory_space<vmem>>, %arg8: memref<1x2x32xf32, #tpu.memory_space<vmem>>, %arg9: memref<1x2x32xf32, #tpu.memory_space<vmem>>, %arg10: memref<16x128xf32, #tpu.memory_space<vmem>>) attributes {dimension_semantics = [#tpu.dimension_semantics<arbitrary>], iteration_bounds = array<i64: 1>, scalar_prefetch = 0 : i64, scratch_operands = 1 : i64, tpu.core_type = #tpu.core_type<tc>, window_params = [{pipeline_mode = #tpu.pipeline_mode<synchronous>, transform_indices = @transform_0, window_bounds = array<i64: 16, 27>}, {pipeline_mode = #tpu.pipeline_mode<synchronous>, transform_indices = @transform_1, window_bounds = array<i64: 27, 128>}, {pipeline_mode = #tpu.pipeline_mode<synchronous>, transform_indices = @transform_2, window_bounds = array<i64: 32, 128>}, {pipeline_mode = #tpu.pipeline_mode<synchronous>, transform_indices = @transform_3, window_bounds = array<i64: 1, 128>}, {pipeline_mode = #tpu.pipeline_mode<synchronous>, transform_indices = @transform_4, window_bounds = array<i64: 32, 2>}, {pipeline_mode = #tpu.pipeline_mode<synchronous>, transform_indices = @transform_5, window_bounds = array<i64: 1, 2>}, {pipeline_mode = #tpu.pipeline_mode<synchronous>, transform_indices = @transform_6, window_bounds = array<i64: 2, 2>}, {pipeline_mode = #tpu.pipeline_mode<synchronous>, transform_indices = @transform_7, window_bounds = array<i64: 1, 2, 32>}, {pipeline_mode = #tpu.pipeline_mode<synchronous>, transform_indices = @transform_8, window_bounds = array<i64: 1, 2, 32>}]} {
    %c0 = arith.constant 0 : index
    %c0_0 = arith.constant 0 : index
    %0 = vector.load %arg1[%c0, %c0_0] : memref<16x27xf32, #tpu.memory_space<vmem>>, vector<16x27xf32>
    %c0_1 = arith.constant 0 : index
    %c0_2 = arith.constant 0 : index
    %1 = vector.load %arg2[%c0_1, %c0_2] : memref<27x128xf32, #tpu.memory_space<vmem>>, vector<27x128xf32>
    %cst = arith.constant dense<0.000000e+00> : vector<16x128xf32>
    %2 = tpu.matmul %0, %1, %cst {dimension_numbers = #tpu.dot_dimension_numbers<[1], [0], [0], [1], [0, 0, 1, 1], [], []>} : vector<16x27xf32>, vector<27x128xf32>, vector<16x128xf32> -> vector<16x128xf32>
    %c0_3 = arith.constant 0 : index
    %c0_4 = arith.constant 0 : index
    %3 = vector.load %arg4[%c0_3, %c0_4] : memref<1x128xf32, #tpu.memory_space<vmem>>, vector<1x128xf32>
    %4 = vector.broadcast %3 : vector<1x128xf32> to vector<16x128xf32>
    %5 = arith.addf %2, %4 : vector<16x128xf32>
    %c0_5 = arith.constant 0 : index
    %c0_6 = arith.constant 0 : index
    %6 = vector.load %arg10[%c0_5, %c0_6] : memref<16x128xf32, #tpu.memory_space<vmem>>, vector<16x128xf32>
    tpu.vector_store %arg10[%c0_5, %c0_6], %5 {strides = array<i32>} : memref<16x128xf32, #tpu.memory_space<vmem>>, vector<16x128xf32>,
    %c0_7 = arith.constant 0 : index
    %c0_8 = arith.constant 0 : index
    %7 = vector.load %arg3[%c0_7, %c0_8] : memref<32x128xf32, #tpu.memory_space<vmem>>, vector<32x128xf32>
    %cst_9 = arith.constant 0.000000e+00 : f32
    %8 = vector.broadcast %cst_9 : f32 to vector<2x32xf32>
    %cst_10 = arith.constant 0.000000e+00 : f32
    %9 = vector.broadcast %cst_10 : f32 to vector<2x32xf32>
    %c0_i32 = arith.constant 0 : i32
    %c2_i32 = arith.constant 2 : i32
    %10 = arith.muli %c0_i32, %c2_i32 : i32
    %11 = tpu.assume_multiple %10, 2 : i32
    %12 = arith.index_cast %11 : i32 to index
    %c0_11 = arith.constant 0 : index
    %13 = vector.load %arg10[%12, %c0_11] : memref<16x128xf32, #tpu.memory_space<vmem>>, vector<2x128xf32>
    %cst_12 = arith.constant dense<0.000000e+00> : vector<2x128xf32>
    %14 = tpu.matmul %8, %7, %cst_12 {dimension_numbers = #tpu.dot_dimension_numbers<[1], [0], [0], [1], [0, 0, 1, 1], [], []>} : vector<2x32xf32>, vector<32x128xf32>, vector<2x128xf32> -> vector<2x128xf32>
    %15 = arith.addf %13, %14 : vector<2x128xf32>
    %16 = vector.extract_strided_slice %15 {offsets = [0, 0], sizes = [2, 32], strides = [1, 1]} : vector<2x128xf32> to vector<2x32xf32>
    %17 = arith.negf %16 : vector<2x32xf32>
    %18 = math.exp %17 : vector<2x32xf32>
    %cst_13 = arith.constant 1.000000e+00 : f32
    %19 = vector.broadcast %cst_13 : f32 to vector<2x32xf32>
    %20 = arith.addf %19, %18 : vector<2x32xf32>
    %21 = arith.divf %19, %20 : vector<2x32xf32>
    %22 = vector.extract_strided_slice %15 {offsets = [0, 32], sizes = [2, 32], strides = [1, 1]} : vector<2x128xf32> to vector<2x32xf32>
    %23 = arith.negf %22 : vector<2x32xf32>
    %24 = math.exp %23 : vector<2x32xf32>
    %cst_14 = arith.constant 1.000000e+00 : f32
    %25 = vector.broadcast %cst_14 : f32 to vector<2x32xf32>
    %26 = arith.addf %25, %24 : vector<2x32xf32>
    %27 = arith.divf %25, %26 : vector<2x32xf32>
    %28 = vector.extract_strided_slice %15 {offsets = [0, 64], sizes = [2, 32], strides = [1, 1]} : vector<2x128xf32> to vector<2x32xf32>
    %29 = math.tanh %28 : vector<2x32xf32>
    %30 = vector.extract_strided_slice %15 {offsets = [0, 96], sizes = [2, 32], strides = [1, 1]} : vector<2x128xf32> to vector<2x32xf32>
    %31 = arith.negf %30 : vector<2x32xf32>
    %32 = math.exp %31 : vector<2x32xf32>
    %cst_15 = arith.constant 1.000000e+00 : f32
    %33 = vector.broadcast %cst_15 : f32 to vector<2x32xf32>
    %34 = arith.addf %33, %32 : vector<2x32xf32>
    %35 = arith.divf %33, %34 : vector<2x32xf32>
    %36 = arith.mulf %27, %9 : vector<2x32xf32>
    %37 = arith.mulf %21, %29 : vector<2x32xf32>
    %38 = arith.addf %36, %37 : vector<2x32xf32>
    %39 = math.tanh %38 : vector<2x32xf32>
    %40 = arith.mulf %35, %39 : vector<2x32xf32>
    %c1_i32 = arith.constant 1 : i32
    %c2_i32_16 = arith.constant 2 : i32
    %41 = arith.muli %c1_i32, %c2_i32_16 : i32
    %42 = tpu.assume_multiple %41, 2 : i32
    %43 = arith.index_cast %42 : i32 to index
    %c0_17 = arith.constant 0 : index
    %44 = vector.load %arg10[%43, %c0_17] : memref<16x128xf32, #tpu.memory_space<vmem>>, vector<2x128xf32>
    %cst_18 = arith.constant dense<0.000000e+00> : vector<2x128xf32>
    %45 = tpu.matmul %40, %7, %cst_18 {dimension_numbers = #tpu.dot_dimension_numbers<[1], [0], [0], [1], [0, 0, 1, 1], [], []>} : vector<2x32xf32>, vector<32x128xf32>, vector<2x128xf32> -> vector<2x128xf32>
    %46 = arith.addf %44, %45 : vector<2x128xf32>
    %47 = vector.extract_strided_slice %46 {offsets = [0, 0], sizes = [2, 32], strides = [1, 1]} : vector<2x128xf32> to vector<2x32xf32>
    %48 = arith.negf %47 : vector<2x32xf32>
    %49 = math.exp %48 : vector<2x32xf32>
    %cst_19 = arith.constant 1.000000e+00 : f32
    %50 = vector.broadcast %cst_19 : f32 to vector<2x32xf32>
    %51 = arith.addf %50, %49 : vector<2x32xf32>
    %52 = arith.divf %50, %51 : vector<2x32xf32>
    %53 = vector.extract_strided_slice %46 {offsets = [0, 32], sizes = [2, 32], strides = [1, 1]} : vector<2x128xf32> to vector<2x32xf32>
    %54 = arith.negf %53 : vector<2x32xf32>
    %55 = math.exp %54 : vector<2x32xf32>
    %cst_20 = arith.constant 1.000000e+00 : f32
    %56 = vector.broadcast %cst_20 : f32 to vector<2x32xf32>
    %57 = arith.addf %56, %55 : vector<2x32xf32>
    %58 = arith.divf %56, %57 : vector<2x32xf32>
    %59 = vector.extract_strided_slice %46 {offsets = [0, 64], sizes = [2, 32], strides = [1, 1]} : vector<2x128xf32> to vector<2x32xf32>
    %60 = math.tanh %59 : vector<2x32xf32>
    %61 = vector.extract_strided_slice %46 {offsets = [0, 96], sizes = [2, 32], strides = [1, 1]} : vector<2x128xf32> to vector<2x32xf32>
    %62 = arith.negf %61 : vector<2x32xf32>
    %63 = math.exp %62 : vector<2x32xf32>
    %cst_21 = arith.constant 1.000000e+00 : f32
    %64 = vector.broadcast %cst_21 : f32 to vector<2x32xf32>
    %65 = arith.addf %64, %63 : vector<2x32xf32>
    %66 = arith.divf %64, %65 : vector<2x32xf32>
    %67 = arith.mulf %58, %38 : vector<2x32xf32>
    %68 = arith.mulf %52, %60 : vector<2x32xf32>
    %69 = arith.addf %67, %68 : vector<2x32xf32>
    %70 = math.tanh %69 : vector<2x32xf32>
    %71 = arith.mulf %66, %70 : vector<2x32xf32>
    %c2_i32_22 = arith.constant 2 : i32
    %c2_i32_23 = arith.constant 2 : i32
    %72 = arith.muli %c2_i32_22, %c2_i32_23 : i32
    %73 = tpu.assume_multiple %72, 2 : i32
    %74 = arith.index_cast %73 : i32 to index
    %c0_24 = arith.constant 0 : index
    %75 = vector.load %arg10[%74, %c0_24] : memref<16x128xf32, #tpu.memory_space<vmem>>, vector<2x128xf32>
    %cst_25 = arith.constant dense<0.000000e+00> : vector<2x128xf32>
    %76 = tpu.matmul %71, %7, %cst_25 {dimension_numbers = #tpu.dot_dimension_numbers<[1], [0], [0], [1], [0, 0, 1, 1], [], []>} : vector<2x32xf32>, vector<32x128xf32>, vector<2x128xf32> -> vector<2x128xf32>
    %77 = arith.addf %75, %76 : vector<2x128xf32>
    %78 = vector.extract_strided_slice %77 {offsets = [0, 0], sizes = [2, 32], strides = [1, 1]} : vector<2x128xf32> to vector<2x32xf32>
    %79 = arith.negf %78 : vector<2x32xf32>
    %80 = math.exp %79 : vector<2x32xf32>
    %cst_26 = arith.constant 1.000000e+00 : f32
    %81 = vector.broadcast %cst_26 : f32 to vector<2x32xf32>
    %82 = arith.addf %81, %80 : vector<2x32xf32>
    %83 = arith.divf %81, %82 : vector<2x32xf32>
    %84 = vector.extract_strided_slice %77 {offsets = [0, 32], sizes = [2, 32], strides = [1, 1]} : vector<2x128xf32> to vector<2x32xf32>
    %85 = arith.negf %84 : vector<2x32xf32>
    %86 = math.exp %85 : vector<2x32xf32>
    %cst_27 = arith.constant 1.000000e+00 : f32
    %87 = vector.broadcast %cst_27 : f32 to vector<2x32xf32>
    %88 = arith.addf %87, %86 : vector<2x32xf32>
    %89 = arith.divf %87, %88 : vector<2x32xf32>
    %90 = vector.extract_strided_slice %77 {offsets = [0, 64], sizes = [2, 32], strides = [1, 1]} : vector<2x128xf32> to vector<2x32xf32>
    %91 = math.tanh %90 : vector<2x32xf32>
    %92 = vector.extract_strided_slice %77 {offsets = [0, 96], sizes = [2, 32], strides = [1, 1]} : vector<2x128xf32> to vector<2x32xf32>
    %93 = arith.negf %92 : vector<2x32xf32>
    %94 = math.exp %93 : vector<2x32xf32>
    %cst_28 = arith.constant 1.000000e+00 : f32
    %95 = vector.broadcast %cst_28 : f32 to vector<2x32xf32>
    %96 = arith.addf %95, %94 : vector<2x32xf32>
    %97 = arith.divf %95, %96 : vector<2x32xf32>
    %98 = arith.mulf %89, %69 : vector<2x32xf32>
    %99 = arith.mulf %83, %91 : vector<2x32xf32>
    %100 = arith.addf %98, %99 : vector<2x32xf32>
    %101 = math.tanh %100 : vector<2x32xf32>
    %102 = arith.mulf %97, %101 : vector<2x32xf32>
    %c3_i32 = arith.constant 3 : i32
    %c2_i32_29 = arith.constant 2 : i32
    %103 = arith.muli %c3_i32, %c2_i32_29 : i32
    %104 = tpu.assume_multiple %103, 2 : i32
    %105 = arith.index_cast %104 : i32 to index
    %c0_30 = arith.constant 0 : index
    %106 = vector.load %arg10[%105, %c0_30] : memref<16x128xf32, #tpu.memory_space<vmem>>, vector<2x128xf32>
    %cst_31 = arith.constant dense<0.000000e+00> : vector<2x128xf32>
    %107 = tpu.matmul %102, %7, %cst_31 {dimension_numbers = #tpu.dot_dimension_numbers<[1], [0], [0], [1], [0, 0, 1, 1], [], []>} : vector<2x32xf32>, vector<32x128xf32>, vector<2x128xf32> -> vector<2x128xf32>
    %108 = arith.addf %106, %107 : vector<2x128xf32>
    %109 = vector.extract_strided_slice %108 {offsets = [0, 0], sizes = [2, 32], strides = [1, 1]} : vector<2x128xf32> to vector<2x32xf32>
    %110 = arith.negf %109 : vector<2x32xf32>
    %111 = math.exp %110 : vector<2x32xf32>
    %cst_32 = arith.constant 1.000000e+00 : f32
    %112 = vector.broadcast %cst_32 : f32 to vector<2x32xf32>
    %113 = arith.addf %112, %111 : vector<2x32xf32>
    %114 = arith.divf %112, %113 : vector<2x32xf32>
    %115 = vector.extract_strided_slice %108 {offsets = [0, 32], sizes = [2, 32], strides = [1, 1]} : vector<2x128xf32> to vector<2x32xf32>
    %116 = arith.negf %115 : vector<2x32xf32>
    %117 = math.exp %116 : vector<2x32xf32>
    %cst_33 = arith.constant 1.000000e+00 : f32
    %118 = vector.broadcast %cst_33 : f32 to vector<2x32xf32>
    %119 = arith.addf %118, %117 : vector<2x32xf32>
    %120 = arith.divf %118, %119 : vector<2x32xf32>
    %121 = vector.extract_strided_slice %108 {offsets = [0, 64], sizes = [2, 32], strides = [1, 1]} : vector<2x128xf32> to vector<2x32xf32>
    %122 = math.tanh %121 : vector<2x32xf32>
    %123 = vector.extract_strided_slice %108 {offsets = [0, 96], sizes = [2, 32], strides = [1, 1]} : vector<2x128xf32> to vector<2x32xf32>
    %124 = arith.negf %123 : vector<2x32xf32>
    %125 = math.exp %124 : vector<2x32xf32>
    %cst_34 = arith.constant 1.000000e+00 : f32
    %126 = vector.broadcast %cst_34 : f32 to vector<2x32xf32>
    %127 = arith.addf %126, %125 : vector<2x32xf32>
    %128 = arith.divf %126, %127 : vector<2x32xf32>
    %129 = arith.mulf %120, %100 : vector<2x32xf32>
    %130 = arith.mulf %114, %122 : vector<2x32xf32>
    %131 = arith.addf %129, %130 : vector<2x32xf32>
    %132 = math.tanh %131 : vector<2x32xf32>
    %133 = arith.mulf %128, %132 : vector<2x32xf32>
    %c4_i32 = arith.constant 4 : i32
    %c2_i32_35 = arith.constant 2 : i32
    %134 = arith.muli %c4_i32, %c2_i32_35 : i32
    %135 = tpu.assume_multiple %134, 2 : i32
    %136 = arith.index_cast %135 : i32 to index
    %c0_36 = arith.constant 0 : index
    %137 = vector.load %arg10[%136, %c0_36] : memref<16x128xf32, #tpu.memory_space<vmem>>, vector<2x128xf32>
    %cst_37 = arith.constant dense<0.000000e+00> : vector<2x128xf32>
    %138 = tpu.matmul %133, %7, %cst_37 {dimension_numbers = #tpu.dot_dimension_numbers<[1], [0], [0], [1], [0, 0, 1, 1], [], []>} : vector<2x32xf32>, vector<32x128xf32>, vector<2x128xf32> -> vector<2x128xf32>
    %139 = arith.addf %137, %138 : vector<2x128xf32>
    %140 = vector.extract_strided_slice %139 {offsets = [0, 0], sizes = [2, 32], strides = [1, 1]} : vector<2x128xf32> to vector<2x32xf32>
    %141 = arith.negf %140 : vector<2x32xf32>
    %142 = math.exp %141 : vector<2x32xf32>
    %cst_38 = arith.constant 1.000000e+00 : f32
    %143 = vector.broadcast %cst_38 : f32 to vector<2x32xf32>
    %144 = arith.addf %143, %142 : vector<2x32xf32>
    %145 = arith.divf %143, %144 : vector<2x32xf32>
    %146 = vector.extract_strided_slice %139 {offsets = [0, 32], sizes = [2, 32], strides = [1, 1]} : vector<2x128xf32> to vector<2x32xf32>
    %147 = arith.negf %146 : vector<2x32xf32>
    %148 = math.exp %147 : vector<2x32xf32>
    %cst_39 = arith.constant 1.000000e+00 : f32
    %149 = vector.broadcast %cst_39 : f32 to vector<2x32xf32>
    %150 = arith.addf %149, %148 : vector<2x32xf32>
    %151 = arith.divf %149, %150 : vector<2x32xf32>
    %152 = vector.extract_strided_slice %139 {offsets = [0, 64], sizes = [2, 32], strides = [1, 1]} : vector<2x128xf32> to vector<2x32xf32>
    %153 = math.tanh %152 : vector<2x32xf32>
    %154 = vector.extract_strided_slice %139 {offsets = [0, 96], sizes = [2, 32], strides = [1, 1]} : vector<2x128xf32> to vector<2x32xf32>
    %155 = arith.negf %154 : vector<2x32xf32>
    %156 = math.exp %155 : vector<2x32xf32>
    %cst_40 = arith.constant 1.000000e+00 : f32
    %157 = vector.broadcast %cst_40 : f32 to vector<2x32xf32>
    %158 = arith.addf %157, %156 : vector<2x32xf32>
    %159 = arith.divf %157, %158 : vector<2x32xf32>
    %160 = arith.mulf %151, %131 : vector<2x32xf32>
    %161 = arith.mulf %145, %153 : vector<2x32xf32>
    %162 = arith.addf %160, %161 : vector<2x32xf32>
    %163 = math.tanh %162 : vector<2x32xf32>
    %164 = arith.mulf %159, %163 : vector<2x32xf32>
    %c5_i32 = arith.constant 5 : i32
    %c2_i32_41 = arith.constant 2 : i32
    %165 = arith.muli %c5_i32, %c2_i32_41 : i32
    %166 = tpu.assume_multiple %165, 2 : i32
    %167 = arith.index_cast %166 : i32 to index
    %c0_42 = arith.constant 0 : index
    %168 = vector.load %arg10[%167, %c0_42] : memref<16x128xf32, #tpu.memory_space<vmem>>, vector<2x128xf32>
    %cst_43 = arith.constant dense<0.000000e+00> : vector<2x128xf32>
    %169 = tpu.matmul %164, %7, %cst_43 {dimension_numbers = #tpu.dot_dimension_numbers<[1], [0], [0], [1], [0, 0, 1, 1], [], []>} : vector<2x32xf32>, vector<32x128xf32>, vector<2x128xf32> -> vector<2x128xf32>
    %170 = arith.addf %168, %169 : vector<2x128xf32>
    %171 = vector.extract_strided_slice %170 {offsets = [0, 0], sizes = [2, 32], strides = [1, 1]} : vector<2x128xf32> to vector<2x32xf32>
    %172 = arith.negf %171 : vector<2x32xf32>
    %173 = math.exp %172 : vector<2x32xf32>
    %cst_44 = arith.constant 1.000000e+00 : f32
    %174 = vector.broadcast %cst_44 : f32 to vector<2x32xf32>
    %175 = arith.addf %174, %173 : vector<2x32xf32>
    %176 = arith.divf %174, %175 : vector<2x32xf32>
    %177 = vector.extract_strided_slice %170 {offsets = [0, 32], sizes = [2, 32], strides = [1, 1]} : vector<2x128xf32> to vector<2x32xf32>
    %178 = arith.negf %177 : vector<2x32xf32>
    %179 = math.exp %178 : vector<2x32xf32>
    %cst_45 = arith.constant 1.000000e+00 : f32
    %180 = vector.broadcast %cst_45 : f32 to vector<2x32xf32>
    %181 = arith.addf %180, %179 : vector<2x32xf32>
    %182 = arith.divf %180, %181 : vector<2x32xf32>
    %183 = vector.extract_strided_slice %170 {offsets = [0, 64], sizes = [2, 32], strides = [1, 1]} : vector<2x128xf32> to vector<2x32xf32>
    %184 = math.tanh %183 : vector<2x32xf32>
    %185 = vector.extract_strided_slice %170 {offsets = [0, 96], sizes = [2, 32], strides = [1, 1]} : vector<2x128xf32> to vector<2x32xf32>
    %186 = arith.negf %185 : vector<2x32xf32>
    %187 = math.exp %186 : vector<2x32xf32>
    %cst_46 = arith.constant 1.000000e+00 : f32
    %188 = vector.broadcast %cst_46 : f32 to vector<2x32xf32>
    %189 = arith.addf %188, %187 : vector<2x32xf32>
    %190 = arith.divf %188, %189 : vector<2x32xf32>
    %191 = arith.mulf %182, %162 : vector<2x32xf32>
    %192 = arith.mulf %176, %184 : vector<2x32xf32>
    %193 = arith.addf %191, %192 : vector<2x32xf32>
    %194 = math.tanh %193 : vector<2x32xf32>
    %195 = arith.mulf %190, %194 : vector<2x32xf32>
    %c6_i32 = arith.constant 6 : i32
    %c2_i32_47 = arith.constant 2 : i32
    %196 = arith.muli %c6_i32, %c2_i32_47 : i32
    %197 = tpu.assume_multiple %196, 2 : i32
    %198 = arith.index_cast %197 : i32 to index
    %c0_48 = arith.constant 0 : index
    %199 = vector.load %arg10[%198, %c0_48] : memref<16x128xf32, #tpu.memory_space<vmem>>, vector<2x128xf32>
    %cst_49 = arith.constant dense<0.000000e+00> : vector<2x128xf32>
    %200 = tpu.matmul %195, %7, %cst_49 {dimension_numbers = #tpu.dot_dimension_numbers<[1], [0], [0], [1], [0, 0, 1, 1], [], []>} : vector<2x32xf32>, vector<32x128xf32>, vector<2x128xf32> -> vector<2x128xf32>
    %201 = arith.addf %199, %200 : vector<2x128xf32>
    %202 = vector.extract_strided_slice %201 {offsets = [0, 0], sizes = [2, 32], strides = [1, 1]} : vector<2x128xf32> to vector<2x32xf32>
    %203 = arith.negf %202 : vector<2x32xf32>
    %204 = math.exp %203 : vector<2x32xf32>
    %cst_50 = arith.constant 1.000000e+00 : f32
    %205 = vector.broadcast %cst_50 : f32 to vector<2x32xf32>
    %206 = arith.addf %205, %204 : vector<2x32xf32>
    %207 = arith.divf %205, %206 : vector<2x32xf32>
    %208 = vector.extract_strided_slice %201 {offsets = [0, 32], sizes = [2, 32], strides = [1, 1]} : vector<2x128xf32> to vector<2x32xf32>
    %209 = arith.negf %208 : vector<2x32xf32>
    %210 = math.exp %209 : vector<2x32xf32>
    %cst_51 = arith.constant 1.000000e+00 : f32
    %211 = vector.broadcast %cst_51 : f32 to vector<2x32xf32>
    %212 = arith.addf %211, %210 : vector<2x32xf32>
    %213 = arith.divf %211, %212 : vector<2x32xf32>
    %214 = vector.extract_strided_slice %201 {offsets = [0, 64], sizes = [2, 32], strides = [1, 1]} : vector<2x128xf32> to vector<2x32xf32>
    %215 = math.tanh %214 : vector<2x32xf32>
    %216 = vector.extract_strided_slice %201 {offsets = [0, 96], sizes = [2, 32], strides = [1, 1]} : vector<2x128xf32> to vector<2x32xf32>
    %217 = arith.negf %216 : vector<2x32xf32>
    %218 = math.exp %217 : vector<2x32xf32>
    %cst_52 = arith.constant 1.000000e+00 : f32
    %219 = vector.broadcast %cst_52 : f32 to vector<2x32xf32>
    %220 = arith.addf %219, %218 : vector<2x32xf32>
    %221 = arith.divf %219, %220 : vector<2x32xf32>
    %222 = arith.mulf %213, %193 : vector<2x32xf32>
    %223 = arith.mulf %207, %215 : vector<2x32xf32>
    %224 = arith.addf %222, %223 : vector<2x32xf32>
    %225 = math.tanh %224 : vector<2x32xf32>
    %226 = arith.mulf %221, %225 : vector<2x32xf32>
    %c7_i32 = arith.constant 7 : i32
    %c2_i32_53 = arith.constant 2 : i32
    %227 = arith.muli %c7_i32, %c2_i32_53 : i32
    %228 = tpu.assume_multiple %227, 2 : i32
    %229 = arith.index_cast %228 : i32 to index
    %c0_54 = arith.constant 0 : index
    %230 = vector.load %arg10[%229, %c0_54] : memref<16x128xf32, #tpu.memory_space<vmem>>, vector<2x128xf32>
    %cst_55 = arith.constant dense<0.000000e+00> : vector<2x128xf32>
    %231 = tpu.matmul %226, %7, %cst_55 {dimension_numbers = #tpu.dot_dimension_numbers<[1], [0], [0], [1], [0, 0, 1, 1], [], []>} : vector<2x32xf32>, vector<32x128xf32>, vector<2x128xf32> -> vector<2x128xf32>
    %232 = arith.addf %230, %231 : vector<2x128xf32>
    %233 = vector.extract_strided_slice %232 {offsets = [0, 0], sizes = [2, 32], strides = [1, 1]} : vector<2x128xf32> to vector<2x32xf32>
    %234 = arith.negf %233 : vector<2x32xf32>
    %235 = math.exp %234 : vector<2x32xf32>
    %cst_56 = arith.constant 1.000000e+00 : f32
    %236 = vector.broadcast %cst_56 : f32 to vector<2x32xf32>
    %237 = arith.addf %236, %235 : vector<2x32xf32>
    %238 = arith.divf %236, %237 : vector<2x32xf32>
    %239 = vector.extract_strided_slice %232 {offsets = [0, 32], sizes = [2, 32], strides = [1, 1]} : vector<2x128xf32> to vector<2x32xf32>
    %240 = arith.negf %239 : vector<2x32xf32>
    %241 = math.exp %240 : vector<2x32xf32>
    %cst_57 = arith.constant 1.000000e+00 : f32
    %242 = vector.broadcast %cst_57 : f32 to vector<2x32xf32>
    %243 = arith.addf %242, %241 : vector<2x32xf32>
    %244 = arith.divf %242, %243 : vector<2x32xf32>
    %245 = vector.extract_strided_slice %232 {offsets = [0, 64], sizes = [2, 32], strides = [1, 1]} : vector<2x128xf32> to vector<2x32xf32>
    %246 = math.tanh %245 : vector<2x32xf32>
    %247 = vector.extract_strided_slice %232 {offsets = [0, 96], sizes = [2, 32], strides = [1, 1]} : vector<2x128xf32> to vector<2x32xf32>
    %248 = arith.negf %247 : vector<2x32xf32>
    %249 = math.exp %248 : vector<2x32xf32>
    %cst_58 = arith.constant 1.000000e+00 : f32
    %250 = vector.broadcast %cst_58 : f32 to vector<2x32xf32>
    %251 = arith.addf %250, %249 : vector<2x32xf32>
    %252 = arith.divf %250, %251 : vector<2x32xf32>
    %253 = arith.mulf %244, %224 : vector<2x32xf32>
    %254 = arith.mulf %238, %246 : vector<2x32xf32>
    %255 = arith.addf %253, %254 : vector<2x32xf32>
    %256 = math.tanh %255 : vector<2x32xf32>
    %257 = arith.mulf %252, %256 : vector<2x32xf32>
    %c8_i32 = arith.constant 8 : i32
    %c0_59 = arith.constant 0 : index
    %c0_60 = arith.constant 0 : index
    %258 = vector.load %arg5[%c0_59, %c0_60] : memref<32x2xf32, #tpu.memory_space<vmem>>, vector<32x2xf32>
    %cst_61 = arith.constant dense<0.000000e+00> : vector<2x2xf32>
    %259 = tpu.matmul %257, %258, %cst_61 {dimension_numbers = #tpu.dot_dimension_numbers<[1], [0], [0], [1], [0, 0, 1, 1], [], []>} : vector<2x32xf32>, vector<32x2xf32>, vector<2x2xf32> -> vector<2x2xf32>
    %c0_62 = arith.constant 0 : index
    %c0_63 = arith.constant 0 : index
    %260 = vector.load %arg6[%c0_62, %c0_63] : memref<1x2xf32, #tpu.memory_space<vmem>>, vector<1x2xf32>
    %261 = vector.broadcast %260 : vector<1x2xf32> to vector<2x2xf32>
    %262 = arith.addf %259, %261 : vector<2x2xf32>
    %263 = arith.negf %262 : vector<2x2xf32>
    %264 = math.exp %263 : vector<2x2xf32>
    %cst_64 = arith.constant 1.000000e+00 : f32
    %265 = vector.broadcast %cst_64 : f32 to vector<2x2xf32>
    %266 = arith.addf %265, %264 : vector<2x2xf32>
    %267 = arith.divf %265, %266 : vector<2x2xf32>
    %c0_65 = arith.constant 0 : index
    %c0_66 = arith.constant 0 : index
    %268 = vector.load %arg7[%c0_65, %c0_66] : memref<2x2xf32, #tpu.memory_space<vmem>>, vector<2x2xf32>
    tpu.vector_store %arg7[%c0_65, %c0_66], %267 {strides = array<i32>} : memref<2x2xf32, #tpu.memory_space<vmem>>, vector<2x2xf32>,
    %c0_67 = arith.constant 0 : index
    %c0_68 = arith.constant 0 : index
    %c0_69 = arith.constant 0 : index
    %269 = vector.load %arg8[%c0_67, %c0_68, %c0_69] : memref<1x2x32xf32, #tpu.memory_space<vmem>>, vector<1x2x32xf32>
    %270 = vector.shape_cast %269 : vector<1x2x32xf32> to vector<2x32xf32>
    %271 = vector.shape_cast %257 : vector<2x32xf32> to vector<1x2x32xf32>
    tpu.vector_store %arg8[%c0_67, %c0_68, %c0_69], %271 {strides = array<i32>} : memref<1x2x32xf32, #tpu.memory_space<vmem>>, vector<1x2x32xf32>,
    %c0_70 = arith.constant 0 : index
    %c0_71 = arith.constant 0 : index
    %c0_72 = arith.constant 0 : index
    %272 = vector.load %arg9[%c0_70, %c0_71, %c0_72] : memref<1x2x32xf32, #tpu.memory_space<vmem>>, vector<1x2x32xf32>
    %273 = vector.shape_cast %272 : vector<1x2x32xf32> to vector<2x32xf32>
    %274 = vector.shape_cast %255 : vector<2x32xf32> to vector<1x2x32xf32>
    tpu.vector_store %arg9[%c0_70, %c0_71, %c0_72], %274 {strides = array<i32>} : memref<1x2x32xf32, #tpu.memory_space<vmem>>, vector<1x2x32xf32>,
    return
  }
  func.func @transform_0(%arg0: i32) -> (i32, i32) {
    %c0_i32 = arith.constant 0 : i32
    %c0_i32_0 = arith.constant 0 : i32
    %c0_i32_1 = arith.constant 0 : i32
    return %c0_i32, %c0_i32_0 : i32, i32
  }
  func.func @transform_1(%arg0: i32) -> (i32, i32) {
    %c0_i32 = arith.constant 0 : i32
    %c0_i32_0 = arith.constant 0 : i32
    %c0_i32_1 = arith.constant 0 : i32
    return %c0_i32, %c0_i32_0 : i32, i32
  }
  func.func @transform_2(%arg0: i32) -> (i32, i32) {
    %c0_i32 = arith.constant 0 : i32
    %c0_i32_0 = arith.constant 0 : i32
    %c0_i32_1 = arith.constant 0 : i32
    return %c0_i32, %c0_i32_0 : i32, i32
  }
  func.func @transform_3(%arg0: i32) -> (i32, i32) {
    %c0_i32 = arith.constant 0 : i32
    %c0_i32_0 = arith.constant 0 : i32
    %c0_i32_1 = arith.constant 0 : i32
    return %c0_i32, %c0_i32_0 : i32, i32
  }
  func.func @transform_4(%arg0: i32) -> (i32, i32) {
    %c0_i32 = arith.constant 0 : i32
    %c0_i32_0 = arith.constant 0 : i32
    %c0_i32_1 = arith.constant 0 : i32
    return %c0_i32, %c0_i32_0 : i32, i32
  }
  func.func @transform_5(%arg0: i32) -> (i32, i32) {
    %c0_i32 = arith.constant 0 : i32
    %c0_i32_0 = arith.constant 0 : i32
    %c0_i32_1 = arith.constant 0 : i32
    return %c0_i32, %c0_i32_0 : i32, i32
  }
  func.func @transform_6(%arg0: i32) -> (i32, i32) {
    %c0_i32 = arith.constant 0 : i32
    %c0_i32_0 = arith.constant 0 : i32
    %c0_i32_1 = arith.constant 0 : i32
    return %c0_i32, %c0_i32_0 : i32, i32
  }
  func.func @transform_7(%arg0: i32) -> (i32, i32, i32) {
    %c0_i32 = arith.constant 0 : i32
    %c0_i32_0 = arith.constant 0 : i32
    %c0_i32_1 = arith.constant 0 : i32
    %c0_i32_2 = arith.constant 0 : i32
    return %c0_i32, %c0_i32_0, %c0_i32_1 : i32, i32, i32
  }
  func.func @transform_8(%arg0: i32) -> (i32, i32, i32) {
    %c0_i32 = arith.constant 0 : i32
    %c0_i32_0 = arith.constant 0 : i32
    %c0_i32_1 = arith.constant 0 : i32
    %c0_i32_2 = arith.constant 0 : i32
    return %c0_i32, %c0_i32_0, %c0_i32_1 : i32, i32, i32
  }
}

</mosaic_0001>

<bundles_post_ra>
// kernel: classifier_lstm_forward.1
= control target key start
LH: loop header
LB: loop body
LE: loop exit
PB: predicated region body
PF: predicated region fallthrough
CT: control target
= control target key end

     0   :  { %14 = vsyncpa [#allocation4], 0  ;;  %s1809_s0 = inlined_call_operand.vmem [shape: f32[16,27], index: 0, kind: input, shape index: {}]   ;;  %s1810_s1 = inlined_call_operand.hbm [shape: f32[27,128], index: 1, kind: input, shape index: {}]   ;;  %s1811_s2 = inlined_call_operand.hbm [shape: f32[32,128], index: 2, kind: input, shape index: {}]   ;;  %s1812_s3 = inlined_call_operand.vmem [shape: f32[1,128], index: 3, kind: input, shape index: {}]   ;;  %s1813_s4 = inlined_call_operand.vmem [shape: f32[32,2], index: 4, kind: input, shape index: {}]   ;;  %s1814_s5 = inlined_call_operand.vmem [shape: f32[1,2], index: 5, kind: input, shape index: {}]   ;;  %s1815_s6 = inlined_call_operand.hbm [shape: f32[2,2], index: 6, kind: output, shape index: {0}]   ;;  %s1816_s7 = inlined_call_operand.hbm [shape: f32[1,2,32], index: 7, kind: output, shape index: {1}]   ;;  %s1817_s8 = inlined_call_operand.hbm [shape: f32[1,2,32], index: 8, kind: output, shape index: {2}]  }
   0x1   :  { %15 = vsyncpa [#allocation7], 0 }
   0x2   :  { %16 = vsyncpa [#allocation5], 0 }
   0x3   :  { %17 = vsyncpa [#allocation10], 0  ;;  %s1567_s27 = smov [#allocation3]   ;;  %s1449_s9 = scalar_lea.hbm %s1810_s1, 512 }
   0x4   :  { %s25_s28 = sshll.u32 %s1567_s27, 4  ;;  %p1450_p0 = scmp.ne.s32.totalorder %s1810_s1, %s1449_s9  ;;  %s26_s28 = int_to_ptr.vmem [resolvable:$true] %s25_s28 }
   0x5   :  { %p1453_p1 = scmp.lt.u32.totalorder %s1449_s9, %s1810_s1 }
   0x7   :  { %p1455_p2 = pnand %p1453_p1, %p1450_p0 }
   0x9   :  { %1458 = shalt.err (!%p1455_p2)
}
   0xa   :  { %s1459_s14 = scalar_lea.vmem %s26_s28, 512  ;;  %p1464_p4 = scmp.lt.s32.totalorder %s26_s28, %s26_s28 }
   0xb   :  { %p1460_p3 = scmp.ne.s32.totalorder %s26_s28, %s1459_s14  ;;  %p1465_p5 = scmp.lt.s32.totalorder %s1459_s14, %s1459_s14 }
   0xd   :  { %p1466_p6 = por %p1465_p5, %p1464_p4 }
   0xf   :  { %p1467_p7 = pnand %p1466_p6, %p1460_p3 }
  0x11   :  { %1470 = shalt.err (!%p1467_p7)
}
  0x12   :  { %s1568_s15 = smov 128   ;;  %s1569_s16 = smov 8  }
  0x13   :  { %31 = dma.hbm_to_vmem [thread:$0]  %s1810_s1, 512, %s26_s28, [#allocation4], %s1568_s15, %s1568_s15, %s1569_s16  }
  0x14   :  { %s1570_s19 = smov [#allocation6]   ;;  %s1471_s23 = scalar_lea.hbm %s1811_s2, 512 }
  0x15   :  { %s37_s20 = sshll.u32 %s1570_s19, 4  ;;  %p1472_p8 = scmp.ne.s32.totalorder %s1811_s2, %s1471_s23  ;;  %s38_s20 = int_to_ptr.vmem [resolvable:$true] %s37_s20 }
  0x16   :  { %p1475_p9 = scmp.lt.u32.totalorder %s1471_s23, %s1811_s2 }
  0x18   :  { %p1477_p10 = pnand %p1475_p9, %p1472_p8 }
  0x1a   :  { %1480 = shalt.err (!%p1477_p10)
}
  0x1b   :  { %s1481_s29 = scalar_lea.vmem %s38_s20, 512  ;;  %p1486_p12 = scmp.lt.s32.totalorder %s38_s20, %s38_s20 }
  0x1c   :  { %p1482_p11 = scmp.ne.s32.totalorder %s38_s20, %s1481_s29  ;;  %p1487_p13 = scmp.lt.s32.totalorder %s1481_s29, %s1481_s29 }
  0x1e   :  { %p1488_p0 = por %p1487_p13, %p1486_p12 }
  0x20   :  { %p1489_p1 = pnand %p1488_p0, %p1482_p11 }
  0x22   :  { %1492 = shalt.err (!%p1489_p1)
}
  0x23   :  { %43 = dma.hbm_to_vmem [thread:$0]  %s1811_s2, 512, %s38_s20, [#allocation7], %s1568_s15, %s1568_s15, %s1569_s16  }
  0x24   :  { %1559 = dma.done.wait [#allocation4], 512  }
  0x25   :  { %1560 = vsyncadd [#allocation4], 4294966784 }
  0x26   :  { %1561 = dma.done.wait [#allocation7], 512  }
  0x27   :  { %1562 = vsyncadd [#allocation7], 4294966784  ;;  %v1571_v0 = vmov 0.0|0.0   ;;  %vm1572_vm0 = vmmov 0   ;;  %v1573_v1 = vmov 0.0   ;;  %vm76_vm1 = vcmask 1042432  }
  0x28   :  { %1313 = vmatprep.subr.bf16.mxu1 %v1571_v0  ;;  %1212 = vmatprep.mubr.msk.f32.mxu1 %vm1572_vm0, %v1573_v1  ;;  %vm69_vm2 = vcmask 220160   ;;  %v58_v2 = vld [vmem:[#allocation3] sm:$0xff]  ;;  %v59_v3 = vld [vmem:[#allocation3 + $0x8] sm:$0xff]  ;;  %v60_v4 = vld [vmem:[#allocation3 + $0x10] sm:$0xff]  ;;  %vm1574_vm3 = vmmov 1   ;;  %s1575_s12 = smov 64  }
  0x29   :  { %v1303_v5 = vpack.c.bf16 %v59_v3, %v58_v2  ;;  %v61_v6 = vld [vmem:[#allocation3 + $0x18] sm:$0x7]  ;;  %vm1308_vm4 = vmpackc.low %vm76_vm1, %vm1574_vm3  ;;  %v56_v7 = vld [vmem:[%s1809_s0] sm:$0xff]  ;;  %vm162_vm5 = vcmask 261120   ;;  %s1577_s21 = smov 96   ;;  %vm1070_vm6 = vcmask 254976  }
  0x2a   :  { %v1307_v8 = vpack.c.bf16 %v61_v6, %v60_v4  ;;  %1201 = vmatprep.mubr.msk.f32.mxu0 %vm69_vm2, %v56_v7  ;;  %v157_v9 = vld [vmem:[#allocation6] sm:$0xff]  ;;  %v158_v10 = vld [vmem:[#allocation6 + $0x8] sm:$0xff]  ;;  %v159_v11 = vld [vmem:[#allocation6 + $0x10] sm:$0xff] }
  0x2b   :  { %1304 = vmatprep.subr.bf16.mxu0 %v1303_v5  ;;  %v1657_v12 = vpack.c.bf16 %v158_v10, %v157_v9  ;;  %v160_v13 = vld [vmem:[#allocation6 + $0x18] sm:$0xff]  ;;  %v1120_v16 = vld [vmem:[%s1812_s3] ss:$0 sm:$0xff]  ;;  %s1576_s3 = smov 32  }
  0x2c   :  { %1306 = vmatpush3.bf16.msra.mxu0 %v1303_v5  ;;  %v1660_v14 = vpack.c.bf16 %v160_v13, %v159_v11  ;;  %v57_v15 = vld [vmem:[%s1809_s0 + $0x8] sm:$0xff] }
  0x2d   :  { %1309 = vmatprep.subr.msk.bf16.mxu0 %vm1308_vm4, %v1307_v8  ;;  %1315 = vmatpush3.bf16.msra.mxu1 %v1657_v12 }
  0x2e   :  { %1316 = vmatprep.subr.bf16.mxu1 %v1571_v0 }
  0x30   :  { %1312 = vmatpush3.bf16.msk.msra.mxu0 %vm1308_vm4, %v1307_v8 }
  0x31   :  { %1318 = vmatpush3.bf16.msra.mxu1 %v1660_v14  ;;  %1319 = vmatprep.subr.bf16.mxu0 %v1571_v0 }
  0x32   :  { %1325 = vmatprep.subr.bf16.mxu1 %v1571_v0 }
  0x33   :  { %1202 = vmatmul.mubr.msk.f32.vlgmr.msra.gmra.mrb[0].mxu0 %vm69_vm2, %v57_v15 }
  0x34   :  { %1213 = vmatmul.mubr.f32.vlgmr.msra.gmra.mrb[0].mxu1 %v1573_v1  ;;  %1321 = vmatpush3.bf16.msra.mxu0 %v1657_v12 }
  0x35   :  { %1322 = vmatprep.subr.bf16.mxu0 %v1571_v0  ;;  %1223 = vmatprep.mubr.msk.f32.mxu0 %vm1572_vm0, %v1573_v1 }
  0x36   :  { %1327 = vmatpush3.bf16.msra.mxu1 %v1657_v12  ;;  %1234 = vmatprep.mubr.msk.f32.mxu1 %vm1572_vm0, %v1573_v1 }
  0x37   :  { %1328 = vmatprep.subr.bf16.mxu1 %v1571_v0 }
  0x38   :  { %1324 = vmatpush3.bf16.msra.mxu0 %v1660_v14 }
  0x39   :  { %1331 = vmatprep.subr.bf16.mxu0 %v1571_v0 }
  0x3a   :  { %1330 = vmatpush3.bf16.msra.mxu1 %v1660_v14 }
  0x3b   :  { %1337 = vmatprep.subr.bf16.mxu1 %v1571_v0 }
 0x106   :  { %v1203_v17 = vpop.f32.mrb[0].mxu0 }
 0x107   :  { %v152_v18 = vadd.f32 %v1203_v17, %v1120_v16  ;;  %v146_v19 = vpop.f32.mrb[1].mxu0  ;;  %v232_v20 = vpop.f32.mrb[0].mxu1 }
 0x108   :  { %v147_v21 = vadd.f32 %v1120_v16, %v146_v19  ;;  %v1214_v22 = vpop.f32.mrb[1].mxu1 }
 0x109   :  { %156 = vst [vmem:[#allocation2 + $0x8] sm:$0xff] %v152_v18 }
 0x10a   :  { %155 = vst [vmem:[#allocation2] sm:$0xff] %v147_v21 }
 0x111   :  { %v161_v23 = vld [vmem:[#allocation2] sm:$0x3]  ;;  %v262_v39 = vld [vmem:[#allocation2 + $0x2] sm:$0x3]  ;;  %v364_v57 = vld [vmem:[#allocation2 + $0x4] sm:$0x3] }
 0x112   :  { %v236_v24 = vadd.f32 %v232_v20, %v161_v23  ;;  %v466_v15 = vld [vmem:[#allocation2 + $0x6] sm:$0x3] }
 0x114   :  { %1381 = vtanh.f32 %v236_v24  ;;  %v1124_v26 = vmul.f32 -1.442695, %v236_v24 }
 0x116   :  { %1383 = vpow2.f32 %v1124_v26 }
 0x11e   :  { %v1382_v25 = vpop.eup %1381 }
 0x11f   :  { %246 = vrot.lane.b32.xlu0 %v1382_v25, %s1575_s12 }
 0x120   :  { %v1384_v27 = vpop.eup %1383 }
 0x121   :  { %v240_v28 = vadd.f32 1.0, %v1384_v27 }
 0x123   :  { %1385 = vrcp.f32 %v240_v28 }
 0x12d   :  { %v1386_v29 = vpop.eup %1385 }
 0x12e   :  { %v244_v32 = vmul.f32 0.0, %v1386_v29 }
 0x191   :  { %v247_v30 = vpop.permute.xlu0 %246 }
 0x192   :  { %v249_v31 = vmul.f32 %v1386_v29, %v247_v30 }
 0x194   :  { %251 = vrot.lane.b32.xlu0 %v249_v31, %s1576_s3 }
 0x206   :  { %v252_v33 = vpop.permute.xlu0 %251 }
 0x207   :  { %v254_v34 = vadd.f32 %v252_v33, %v244_v32  ;;  %v568_v33 = vld [vmem:[#allocation2 + $0x8] sm:$0x3] }
 0x209   :  { %1387 = vtanh.f32 %v254_v34 }
 0x213   :  { %v1388_v35 = vpop.eup %1387 }
 0x214   :  { %257 = vrot.lane.b32.xlu1 %v1388_v35, %s1575_s12 }
 0x286   :  { %v258_v36 = vpop.permute.xlu1 %257 }
 0x287   :  { %v260_v37 = vmul.f32 %v1386_v29, %v258_v36 }
 0x289   :  { %264 = vrot.lane.b32.xlu1 %v260_v37, %s1576_s3 }
 0x2fb   :  { %v265_v38 = vpop.permute.xlu1 %264 }
 0x2fc   :  { %1224 = vmatmul.mubr.msk.f32.vlgmr.msra.gmra.mrb[2].mxu0 %vm162_vm5, %v265_v38 }
 0x2fd   :  { %1333 = vmatpush3.bf16.msra.mxu0 %v1657_v12  ;;  %1245 = vmatprep.mubr.msk.f32.mxu0 %vm1572_vm0, %v1573_v1 }
 0x2fe   :  { %1334 = vmatprep.subr.bf16.mxu0 %v1571_v0 }
 0x301   :  { %1336 = vmatpush3.bf16.msra.mxu0 %v1660_v14 }
 0x302   :  { %1343 = vmatprep.subr.bf16.mxu0 %v1571_v0 }
 0x3cf   :  { %v334_v40 = vpop.f32.mrb[2].mxu0 }
 0x3d0   :  { %v338_v41 = vadd.f32 %v334_v40, %v262_v39  ;;  %v1225_v42 = vpop.f32.mrb[3].mxu0 }
 0x3d2   :  { %1389 = vtanh.f32 %v338_v41  ;;  %v1126_v44 = vmul.f32 -1.442695, %v338_v41 }
 0x3d4   :  { %1391 = vpow2.f32 %v1126_v44 }
 0x3dc   :  { %v1390_v43 = vpop.eup %1389 }
 0x3dd   :  { %348 = vrot.lane.b32.xlu0 %v1390_v43, %s1575_s12 }
 0x3de   :  { %v1392_v45 = vpop.eup %1391 }
 0x3df   :  { %v342_v46 = vadd.f32 1.0, %v1392_v45 }
 0x3e1   :  { %1393 = vrcp.f32 %v342_v46 }
 0x3eb   :  { %v1394_v47 = vpop.eup %1393 }
 0x3ec   :  { %v346_v50 = vmul.f32 %v1394_v47, %v254_v34 }
 0x44f   :  { %v349_v48 = vpop.permute.xlu0 %348 }
 0x450   :  { %v351_v49 = vmul.f32 %v1394_v47, %v349_v48 }
 0x452   :  { %353 = vrot.lane.b32.xlu1 %v351_v49, %s1576_s3 }
 0x4c4   :  { %v354_v51 = vpop.permute.xlu1 %353 }
 0x4c5   :  { %v356_v52 = vadd.f32 %v354_v51, %v346_v50  ;;  %v670_v51 = vld [vmem:[#allocation2 + $0xa] sm:$0x3] }
 0x4c7   :  { %1395 = vtanh.f32 %v356_v52 }
 0x4d1   :  { %v1396_v53 = vpop.eup %1395 }
 0x4d2   :  { %359 = vrot.lane.b32.xlu0 %v1396_v53, %s1575_s12 }
 0x544   :  { %v360_v54 = vpop.permute.xlu0 %359 }
 0x545   :  { %v362_v55 = vmul.f32 %v1394_v47, %v360_v54 }
 0x547   :  { %366 = vrot.lane.b32.xlu1 %v362_v55, %s1576_s3 }
 0x5b9   :  { %v367_v56 = vpop.permute.xlu1 %366 }
 0x5ba   :  { %1235 = vmatmul.mubr.msk.f32.vlgmr.msra.gmra.mrb[2].mxu1 %vm162_vm5, %v367_v56 }
 0x5bb   :  { %1339 = vmatpush3.bf16.msra.mxu1 %v1657_v12  ;;  %1256 = vmatprep.mubr.msk.f32.mxu1 %vm1572_vm0, %v1573_v1 }
 0x5bc   :  { %1340 = vmatprep.subr.bf16.mxu1 %v1571_v0 }
 0x5bf   :  { %1342 = vmatpush3.bf16.msra.mxu1 %v1660_v14 }
 0x5c0   :  { %1349 = vmatprep.subr.bf16.mxu1 %v1571_v0 }
 0x68d   :  { %v436_v58 = vpop.f32.mrb[2].mxu1 }
 0x68e   :  { %v440_v59 = vadd.f32 %v436_v58, %v364_v57  ;;  %v1236_v60 = vpop.f32.mrb[3].mxu1 }
 0x690   :  { %1397 = vtanh.f32 %v440_v59  ;;  %v1128_v62 = vmul.f32 -1.442695, %v440_v59 }
 0x692   :  { %1399 = vpow2.f32 %v1128_v62 }
 0x69a   :  { %v1398_v61 = vpop.eup %1397 }
 0x69b   :  { %450 = vrot.lane.b32.xlu0 %v1398_v61, %s1575_s12 }
 0x69c   :  { %v1400_v63 = vpop.eup %1399 }
 0x69d   :  { %v444_v2 = vadd.f32 1.0, %v1400_v63 }
 0x69f   :  { %1401 = vrcp.f32 %v444_v2 }
 0x6a9   :  { %v1402_v3 = vpop.eup %1401 }
 0x6aa   :  { %v448_v6 = vmul.f32 %v1402_v3, %v356_v52 }
 0x70d   :  { %v451_v4 = vpop.permute.xlu0 %450 }
 0x70e   :  { %v453_v5 = vmul.f32 %v1402_v3, %v451_v4 }
 0x710   :  { %455 = vrot.lane.b32.xlu1 %v453_v5, %s1576_s3  ;;  %v772_v5 = vld [vmem:[#allocation2 + $0xc] sm:$0x3] }
 0x782   :  { %v456_v7 = vpop.permute.xlu1 %455 }
 0x783   :  { %v458_v8 = vadd.f32 %v456_v7, %v448_v6 }
 0x785   :  { %1403 = vtanh.f32 %v458_v8 }
 0x78f   :  { %v1404_v9 = vpop.eup %1403 }
 0x790   :  { %461 = vrot.lane.b32.xlu0 %v1404_v9, %s1575_s12 }
 0x802   :  { %v462_v10 = vpop.permute.xlu0 %461 }
 0x803   :  { %v464_v11 = vmul.f32 %v1402_v3, %v462_v10 }
 0x805   :  { %468 = vrot.lane.b32.xlu1 %v464_v11, %s1576_s3 }
 0x877   :  { %v469_v13 = vpop.permute.xlu1 %468 }
 0x878   :  { %1246 = vmatmul.mubr.msk.f32.vlgmr.msra.gmra.mrb[4].mxu0 %vm162_vm5, %v469_v13 }
 0x879   :  { %1345 = vmatpush3.bf16.msra.mxu0 %v1657_v12  ;;  %1267 = vmatprep.mubr.msk.f32.mxu0 %vm1572_vm0, %v1573_v1 }
 0x87a   :  { %1346 = vmatprep.subr.bf16.mxu0 %v1571_v0 }
 0x87d   :  { %1348 = vmatpush3.bf16.msra.mxu0 %v1660_v14 }
 0x87e   :  { %1355 = vmatprep.subr.bf16.mxu0 %v1571_v0 }
 0x94b   :  { %v538_v16 = vpop.f32.mrb[4].mxu0 }
 0x94c   :  { %v542_v17 = vadd.f32 %v538_v16, %v466_v15  ;;  %v1247_v18 = vpop.f32.mrb[5].mxu0 }
 0x94e   :  { %1405 = vtanh.f32 %v542_v17  ;;  %v1130_v20 = vmul.f32 -1.442695, %v542_v17 }
 0x950   :  { %1407 = vpow2.f32 %v1130_v20 }
 0x958   :  { %v1406_v19 = vpop.eup %1405 }
 0x959   :  { %552 = vrot.lane.b32.xlu0 %v1406_v19, %s1575_s12 }
 0x95a   :  { %v1408_v21 = vpop.eup %1407 }
 0x95b   :  { %v546_v22 = vadd.f32 1.0, %v1408_v21 }
 0x95d   :  { %1409 = vrcp.f32 %v546_v22 }
 0x967   :  { %v1410_v23 = vpop.eup %1409 }
 0x968   :  { %v550_v26 = vmul.f32 %v1410_v23, %v458_v8 }
 0x9cb   :  { %v553_v24 = vpop.permute.xlu0 %552 }
 0x9cc   :  { %v555_v25 = vmul.f32 %v1410_v23, %v553_v24  ;;  %v874_v24 = vld [vmem:[#allocation2 + $0xe] sm:$0x3] }
 0x9ce   :  { %557 = vrot.lane.b32.xlu1 %v555_v25, %s1576_s3 }
 0xa40   :  { %v558_v27 = vpop.permute.xlu1 %557 }
 0xa41   :  { %v560_v28 = vadd.f32 %v558_v27, %v550_v26 }
 0xa43   :  { %1411 = vtanh.f32 %v560_v28 }
 0xa4d   :  { %v1412_v29 = vpop.eup %1411 }
 0xa4e   :  { %563 = vrot.lane.b32.xlu0 %v1412_v29, %s1575_s12 }
 0xac0   :  { %v564_v30 = vpop.permute.xlu0 %563 }
 0xac1   :  { %v566_v31 = vmul.f32 %v1410_v23, %v564_v30 }
 0xac3   :  { %570 = vrot.lane.b32.xlu1 %v566_v31, %s1576_s3 }
 0xb35   :  { %v571_v32 = vpop.permute.xlu1 %570 }
 0xb36   :  { %1257 = vmatmul.mubr.msk.f32.vlgmr.msra.gmra.mrb[4].mxu1 %vm162_vm5, %v571_v32 }
 0xb37   :  { %1351 = vmatpush3.bf16.msra.mxu1 %v1657_v12  ;;  %1278 = vmatprep.mubr.msk.f32.mxu1 %vm1572_vm0, %v1573_v1 }
 0xb38   :  { %1352 = vmatprep.subr.bf16.mxu1 %v1571_v0 }
 0xb3b   :  { %1354 = vmatpush3.bf16.msra.mxu1 %v1660_v14 }
 0xb3c   :  { %1361 = vmatprep.subr.bf16.mxu1 %v1571_v0 }
 0xc09   :  { %v640_v34 = vpop.f32.mrb[4].mxu1 }
 0xc0a   :  { %v644_v35 = vadd.f32 %v640_v34, %v568_v33  ;;  %v1258_v36 = vpop.f32.mrb[5].mxu1 }
 0xc0c   :  { %1413 = vtanh.f32 %v644_v35  ;;  %v1132_v38 = vmul.f32 -1.442695, %v644_v35 }
 0xc0e   :  { %1415 = vpow2.f32 %v1132_v38  ;;  %v975_v38 = vld [vmem:[%s1813_s4] sm:$0xff] }
 0xc16   :  { %v1414_v37 = vpop.eup %1413 }
 0xc17   :  { %654 = vrot.lane.b32.xlu0 %v1414_v37, %s1575_s12 }
 0xc18   :  { %v1416_v39 = vpop.eup %1415 }
 0xc19   :  { %v648_v40 = vadd.f32 1.0, %v1416_v39  ;;  %v976_v39 = vld [vmem:[%s1813_s4 + $0x8] sm:$0xff] }
 0xc1b   :  { %1417 = vrcp.f32 %v648_v40  ;;  %v977_v40 = vld [vmem:[%s1813_s4 + $0x10] sm:$0xff] }
 0xc25   :  { %v1418_v41 = vpop.eup %1417 }
 0xc26   :  { %v652_v44 = vmul.f32 %v1418_v41, %v560_v28 }
 0xc89   :  { %v655_v42 = vpop.permute.xlu0 %654 }
 0xc8a   :  { %v657_v43 = vmul.f32 %v1418_v41, %v655_v42  ;;  %v978_v42 = vld [vmem:[%s1813_s4 + $0x18] sm:$0xff]  ;;  %s1578_s4 = smov [#allocation9]  }
 0xc8b   :  { %s1093_s22 = sshll.u32 %s1578_s4, 4  ;;  %s1094_s22 = int_to_ptr.vmem [resolvable:$true] %s1093_s22 }
 0xc8c   :  { %659 = vrot.lane.b32.xlu1 %v657_v43, %s1576_s3  ;;  %v1365_v43 = vpack.c.bf16 %v978_v42, %v977_v40  ;;  %s1493_s23 = scalar_lea.vmem %s1094_s22, 32  ;;  %p1498_p3 = scmp.lt.s32.totalorder %s1094_s22, %s1094_s22 }
 0xc8d   :  { %p1494_p2 = scmp.ne.s32.totalorder %s1094_s22, %s1493_s23  ;;  %p1499_p4 = scmp.lt.s32.totalorder %s1493_s23, %s1493_s23 }
 0xc8f   :  { %p1500_p5 = por %p1499_p4, %p1498_p3 }
 0xc91   :  { %p1501_p6 = pnand %p1500_p5, %p1494_p2 }
 0xcfe   :  { %v660_v45 = vpop.permute.xlu1 %659 }
 0xcff   :  { %v662_v46 = vadd.f32 %v660_v45, %v652_v44 }
 0xd01   :  { %1419 = vtanh.f32 %v662_v46 }
 0xd0b   :  { %v1420_v47 = vpop.eup %1419 }
 0xd0c   :  { %665 = vrot.lane.b32.xlu0 %v1420_v47, %s1575_s12 }
 0xd7e   :  { %v666_v48 = vpop.permute.xlu0 %665 }
 0xd7f   :  { %v668_v49 = vmul.f32 %v1418_v41, %v666_v48  ;;  %v1362_v41 = vpack.c.bf16 %v976_v39, %v975_v38 }
 0xd81   :  { %672 = vrot.lane.b32.xlu1 %v668_v49, %s1576_s3 }
 0xdf3   :  { %v673_v50 = vpop.permute.xlu1 %672 }
 0xdf4   :  { %1268 = vmatmul.mubr.msk.f32.vlgmr.msra.gmra.mrb[6].mxu0 %vm162_vm5, %v673_v50 }
 0xdf5   :  { %1357 = vmatpush3.bf16.msra.mxu0 %v1657_v12  ;;  %1289 = vmatprep.mubr.msk.f32.mxu0 %vm1572_vm0, %v1573_v1 }
 0xdf6   :  { %1358 = vmatprep.subr.bf16.mxu0 %v1571_v0 }
 0xdf9   :  { %1360 = vmatpush3.bf16.msra.mxu0 %v1660_v14 }
 0xec7   :  { %v742_v52 = vpop.f32.mrb[6].mxu0 }
 0xec8   :  { %v746_v53 = vadd.f32 %v742_v52, %v670_v51  ;;  %v1269_v54 = vpop.f32.mrb[7].mxu0 }
 0xeca   :  { %1421 = vtanh.f32 %v746_v53  ;;  %v1134_v56 = vmul.f32 -1.442695, %v746_v53 }
 0xecc   :  { %1423 = vpow2.f32 %v1134_v56 }
 0xed4   :  { %v1422_v55 = vpop.eup %1421 }
 0xed5   :  { %756 = vrot.lane.b32.xlu0 %v1422_v55, %s1575_s12 }
 0xed6   :  { %v1424_v57 = vpop.eup %1423 }
 0xed7   :  { %v750_v58 = vadd.f32 1.0, %v1424_v57 }
 0xed9   :  { %1425 = vrcp.f32 %v750_v58 }
 0xee3   :  { %v1426_v12 = vpop.eup %1425 }
 0xee4   :  { %v754_v61 = vmul.f32 %v1426_v12, %v662_v46 }
 0xf47   :  { %v757_v59 = vpop.permute.xlu0 %756 }
 0xf48   :  { %v759_v60 = vmul.f32 %v1426_v12, %v757_v59 }
 0xf4a   :  { %761 = vrot.lane.b32.xlu1 %v759_v60, %s1576_s3 }
 0xfbc   :  { %v762_v14 = vpop.permute.xlu1 %761 }
 0xfbd   :  { %v764_v62 = vadd.f32 %v762_v14, %v754_v61 }
 0xfbf   :  { %1427 = vtanh.f32 %v764_v62 }
 0xfc9   :  { %v1428_v63 = vpop.eup %1427 }
 0xfca   :  { %767 = vrot.lane.b32.xlu0 %v1428_v63, %s1575_s12 }
0x103c   :  { %v768_v2 = vpop.permute.xlu0 %767 }
0x103d   :  { %v770_v3 = vmul.f32 %v1426_v12, %v768_v2 }
0x103f   :  { %774 = vrot.lane.b32.xlu1 %v770_v3, %s1576_s3 }
0x10b1   :  { %v775_v4 = vpop.permute.xlu1 %774 }
0x10b2   :  { %1279 = vmatmul.mubr.msk.f32.vlgmr.msra.gmra.mrb[6].mxu1 %vm162_vm5, %v775_v4 }
0x10b3   :  { %1300 = vmatprep.mubr.msk.f32.mxu1 %vm1572_vm0, %v1573_v1  ;;  %1363 = vmatpush3.bf16.msra.mxu1 %v1362_v41 }
0x10b4   :  { %1364 = vmatprep.subr.bf16.mxu1 %v1571_v0 }
0x10b7   :  { %1366 = vmatpush3.bf16.msra.mxu1 %v1365_v43 }
0x1185   :  { %v844_v6 = vpop.f32.mrb[6].mxu1 }
0x1186   :  { %v848_v7 = vadd.f32 %v844_v6, %v772_v5  ;;  %v1280_v8 = vpop.f32.mrb[7].mxu1 }
0x1188   :  { %1429 = vtanh.f32 %v848_v7  ;;  %v1136_v10 = vmul.f32 -1.442695, %v848_v7 }
0x118a   :  { %1431 = vpow2.f32 %v1136_v10 }
0x1192   :  { %v1430_v9 = vpop.eup %1429 }
0x1193   :  { %858 = vrot.lane.b32.xlu0 %v1430_v9, %s1575_s12 }
0x1194   :  { %v1432_v11 = vpop.eup %1431 }
0x1195   :  { %v852_v13 = vadd.f32 1.0, %v1432_v11 }
0x1197   :  { %1433 = vrcp.f32 %v852_v13 }
0x11a1   :  { %v1434_v15 = vpop.eup %1433 }
0x11a2   :  { %v856_v18 = vmul.f32 %v1434_v15, %v764_v62 }
0x1205   :  { %v859_v16 = vpop.permute.xlu0 %858 }
0x1206   :  { %v861_v17 = vmul.f32 %v1434_v15, %v859_v16 }
0x1208   :  { %863 = vrot.lane.b32.xlu1 %v861_v17, %s1576_s3 }
0x127a   :  { %v864_v1 = vpop.permute.xlu1 %863 }
0x127b   :  { %v866_v19 = vadd.f32 %v864_v1, %v856_v18 }
0x127d   :  { %1435 = vtanh.f32 %v866_v19 }
0x1287   :  { %v1436_v20 = vpop.eup %1435 }
0x1288   :  { %869 = vrot.lane.b32.xlu0 %v1436_v20, %s1575_s12 }
0x12fa   :  { %v870_v21 = vpop.permute.xlu0 %869 }
0x12fb   :  { %v872_v22 = vmul.f32 %v1434_v15, %v870_v21 }
0x12fd   :  { %876 = vrot.lane.b32.xlu1 %v872_v22, %s1576_s3 }
0x136f   :  { %v877_v23 = vpop.permute.xlu1 %876 }
0x1370   :  { %1290 = vmatmul.mubr.msk.f32.vlgmr.msra.gmra.mrb[8].mxu0 %vm162_vm5, %v877_v23 }
0x1443   :  { %v946_v25 = vpop.f32.mrb[8].mxu0 }
0x1444   :  { %v950_v26 = vadd.f32 %v946_v25, %v874_v24  ;;  %v1291_v27 = vpop.f32.mrb[9].mxu0 }
0x1446   :  { %1437 = vtanh.f32 %v950_v26  ;;  %v1138_v29 = vmul.f32 -1.442695, %v950_v26 }
0x1448   :  { %1439 = vpow2.f32 %v1138_v29 }
0x1450   :  { %v1438_v28 = vpop.eup %1437 }
0x1451   :  { %960 = vrot.lane.b32.xlu0 %v1438_v28, %s1575_s12 }
0x1452   :  { %v1440_v30 = vpop.eup %1439 }
0x1453   :  { %v954_v31 = vadd.f32 1.0, %v1440_v30 }
0x1455   :  { %1441 = vrcp.f32 %v954_v31 }
0x145f   :  { %v1442_v32 = vpop.eup %1441 }
0x1460   :  { %v958_v35 = vmul.f32 %v1442_v32, %v866_v19 }
0x14c3   :  { %v961_v33 = vpop.permute.xlu0 %960 }
0x14c4   :  { %v963_v34 = vmul.f32 %v1442_v32, %v961_v33 }
0x14c6   :  { %965 = vrot.lane.b32.xlu1 %v963_v34, %s1576_s3 }
0x1538   :  { %v966_v36 = vpop.permute.xlu1 %965 }
0x1539   :  { %v968_v37 = vadd.f32 %v966_v36, %v958_v35 }
0x153b   :  { %1443 = vtanh.f32 %v968_v37 }
0x1545   :  { %v1444_v44 = vpop.eup %1443 }
0x1546   :  { %971 = vrot.lane.b32.xlu0 %v1444_v44, %s1575_s12 }
0x154a   :  { %1073 = vrot.lane.b32.xlu0 %v968_v37, %s1577_s21 }
0x15b8   :  { %v972_v45 = vpop.permute.xlu0 %971 }
0x15b9   :  { %v974_v46 = vmul.f32 %v1442_v32, %v972_v45 }
0x15bb   :  { %987 = vrot.lane.b32.xlu1 %v974_v46, %s1576_s3 }
0x15bc   :  { %v1074_v47 = vpop.permute.xlu0 %1073 }
0x15bd   :  { %1076 = vst.msk [vmem:[#allocation11] sm:$0x3] %vm1070_vm6, %v1074_v47 }
0x162d   :  { %v988_v48 = vpop.permute.xlu1 %987 }
0x162e   :  { %1071 = vst.msk [vmem:[#allocation9] sm:$0x3] %vm1070_vm6, %v988_v48  ;;  %1301 = vmatmul.mubr.msk.f32.vlgmr.msra.gmra.mrb[8].mxu1 %vm162_vm5, %v988_v48 }
0x162f   :  { %1504 = shalt.err (!%p1501_p6)
}
0x1630   :  { %s1505_s26 = scalar_lea.hbm %s1816_s7, 32 }
0x1631   :  { %p1506_p7 = scmp.ne.s32.totalorder %s1816_s7, %s1505_s26  ;;  %p1509_p8 = scmp.lt.u32.totalorder %s1505_s26, %s1816_s7 }
0x1633   :  { %p1511_p9 = pnand %p1509_p8, %p1506_p7 }
0x1635   :  { %1514 = shalt.err (!%p1511_p9)
}
0x1636   :  { %1096 = dma.vmem_to_hbm [thread:$0]  %s1094_s22, 32, %s1816_s7, [#allocation10]  }
0x1637   :  { %s1579_s9 = smov [#allocation11]  }
0x1638   :  { %s1103_s10 = sshll.u32 %s1579_s9, 4  ;;  %s1104_s10 = int_to_ptr.vmem [resolvable:$true] %s1103_s10 }
0x1639   :  { %s1515_s0 = scalar_lea.vmem %s1104_s10, 32  ;;  %p1520_p11 = scmp.lt.s32.totalorder %s1104_s10, %s1104_s10 }
0x163a   :  { %p1516_p10 = scmp.ne.s32.totalorder %s1104_s10, %s1515_s0  ;;  %p1521_p12 = scmp.lt.s32.totalorder %s1515_s0, %s1515_s0 }
0x163c   :  { %p1522_p13 = por %p1521_p12, %p1520_p11 }
0x163e   :  { %p1523_p0 = pnand %p1522_p13, %p1516_p10 }
0x1640   :  { %1526 = shalt.err (!%p1523_p0)
}
0x1641   :  { %s1527_s3 = scalar_lea.hbm %s1817_s8, 32 }
0x1642   :  { %p1528_p1 = scmp.ne.s32.totalorder %s1817_s8, %s1527_s3  ;;  %p1531_p2 = scmp.lt.u32.totalorder %s1527_s3, %s1817_s8 }
0x1644   :  { %p1533_p3 = pnand %p1531_p2, %p1528_p1 }
0x1646   :  { %1536 = shalt.err (!%p1533_p3)
}
0x1647   :  { %1106 = dma.vmem_to_hbm [thread:$0]  %s1104_s10, 32, %s1817_s8, [#allocation10]   ;;  %v1139_v0 = vld [vmem:[%s1814_s5] ss:$0 sm:$0xff]  ;;  %vm1067_vm7 = vcmask 9216  }
0x1648   :  { %s1580_s20 = smov [#allocation8]  }
0x1649   :  { %s1083_s21 = sshll.u32 %s1580_s20, 4  ;;  %s1084_s21 = int_to_ptr.vmem [resolvable:$true] %s1083_s21 }
0x164a   :  { %s1537_s4 = scalar_lea.vmem %s1084_s21, 32  ;;  %p1542_p5 = scmp.lt.s32.totalorder %s1084_s21, %s1084_s21 }
0x164b   :  { %p1538_p4 = scmp.ne.s32.totalorder %s1084_s21, %s1537_s4  ;;  %p1543_p6 = scmp.lt.s32.totalorder %s1537_s4, %s1537_s4 }
0x164d   :  { %p1544_p7 = por %p1543_p6, %p1542_p5 }
0x164f   :  { %p1545_p8 = pnand %p1544_p7, %p1538_p4 }
0x1701   :  { %v1057_v49 = vpop.f32.mrb[8].mxu1 }
0x1702   :  { %v1058_v50 = vadd.f32 %v1139_v0, %v1057_v49  ;;  %v1302_v51 = vpop.f32.mrb[9].mxu1 }
0x1704   :  { %v1141_v52 = vmul.f32 -1.442695, %v1058_v50 }
0x1706   :  { %1445 = vpow2.f32 %v1141_v52 }
0x1710   :  { %v1446_v53 = vpop.eup %1445 }
0x1711   :  { %v1064_v54 = vadd.f32 1.0, %v1446_v53 }
0x1713   :  { %1447 = vrcp.f32 %v1064_v54 }
0x171d   :  { %v1448_v55 = vpop.eup %1447 }
0x171e   :  { %1068 = vst.msk [vmem:[#allocation8] sm:$0x3] %vm1067_vm7, %v1448_v55 }
0x171f   :  { %1548 = shalt.err (!%p1545_p8)
}
0x1720   :  { %s1549_s22 = scalar_lea.hbm %s1815_s6, 32 }
0x1721   :  { %p1550_p9 = scmp.ne.s32.totalorder %s1815_s6, %s1549_s22  ;;  %p1553_p10 = scmp.lt.u32.totalorder %s1549_s22, %s1815_s6 }
0x1723   :  { %p1555_p11 = pnand %p1553_p10, %p1550_p9 }
0x1725   :  { %1558 = shalt.err (!%p1555_p11)
}
0x1726   :  { %1086 = dma.vmem_to_hbm [thread:$0]  %s1084_s21, 32, %s1815_s6, [#allocation5]  }
0x1727   :  { %1563 = dma.done.wait [#allocation5], 32  }
0x1728   :  { %1564 = vsyncadd [#allocation5], 4294967264 }
0x1729   :  { %1565 = dma.done.wait [#allocation10], 64  }
0x172a   :  { %1566 = vsyncadd [#allocation10], 4294967232 }
0x172b   :  { %1116 = vsyncpa [#allocation4], 1 }
0x172c   :  { %1117 = vsyncpa [#allocation7], 1 }
0x172d   :  { %1118 = vsyncpa [#allocation5], 1 }
0x172e   :  { %1119 = vsyncpa [#allocation10], 1 }

</bundles_post_ra>
